<compile_context>
chip_gen: v7x
topology: tpu7x:2x2x1
jax: 0.10.0
libtpu: 0.0.40
codegen_flags: <defaults>
</compile_context>

<pallas_src>
import functools

import numpy as np
import jax
import jax.numpy as jnp
from jax import lax
from jax.experimental import pallas as pl
from jax.experimental.pallas import tpu as pltpu


# ----------------------------------------------------------------------------
# Host-side parameter construction (glue)
# ----------------------------------------------------------------------------
def _pil_bilinear_resize_matrix(in_size: int, out_size: int) -> np.ndarray:
    """Row-stochastic resize matrix mimicking PIL's antialiased BILINEAR filter."""
    scale = in_size / out_size
    filterscale = max(scale, 1.0)
    support = 1.0 * filterscale  # triangle filter support == 1.0
    mat = np.zeros((out_size, in_size), dtype=np.float64)
    for i in range(out_size):
        center = (i + 0.5) * scale
        xmin = max(int(center - support + 0.5), 0)
        xmax = min(int(center + support + 0.5), in_size)
        ws = []
        for x in range(xmin, xmax):
            v = (x - center + 0.5) / filterscale
            ws.append(max(0.0, 1.0 - abs(v)))
        tot = sum(ws) if sum(ws) > 0 else 1.0
        for x, w in zip(range(xmin, xmax), ws):
            mat[i, x] = w / tot
    return mat.astype(np.float32)


_JPEG_LUMA_Q = np.array(
    [[16, 11, 10, 16, 24, 40, 51, 61],
     [12, 12, 14, 19, 26, 58, 60, 55],
     [14, 13, 16, 24, 40, 57, 69, 56],
     [14, 17, 22, 29, 51, 87, 80, 62],
     [18, 22, 37, 56, 68, 109, 103, 77],
     [24, 35, 55, 64, 81, 104, 113, 92],
     [49, 64, 78, 87, 103, 121, 120, 101],
     [72, 92, 95, 98, 112, 100, 103, 99]], dtype=np.float64)

_JPEG_CHROMA_Q = np.array(
    [[17, 18, 24, 47, 99, 99, 99, 99],
     [18, 21, 26, 66, 99, 99, 99, 99],
     [24, 26, 56, 99, 99, 99, 99, 99],
     [47, 66, 99, 99, 99, 99, 99, 99],
     [99, 99, 99, 99, 99, 99, 99, 99],
     [99, 99, 99, 99, 99, 99, 99, 99],
     [99, 99, 99, 99, 99, 99, 99, 99],
     [99, 99, 99, 99, 99, 99, 99, 99]], dtype=np.float64)


def _quality_scaled_table(base: np.ndarray, quality: int) -> np.ndarray:
    """libjpeg-style quality scaling of a quantization table."""
    quality = max(1, min(100, int(quality)))
    if quality < 50:
        scale = 5000.0 / quality
    else:
        scale = 200.0 - 2.0 * quality
    q = np.floor((base * scale + 50.0) / 100.0)
    q = np.clip(q, 1.0, 255.0)
    return q.astype(np.float32)


def _dct8_matrix() -> np.ndarray:
    """Orthonormal 8x8 DCT-II matrix."""
    n = 8
    d = np.zeros((n, n), dtype=np.float64)
    for k in range(n):
        c = np.sqrt(1.0 / n) if k == 0 else np.sqrt(2.0 / n)
        for x in range(n):
            d[k, x] = c * np.cos((2 * x + 1) * k * np.pi / (2 * n))
    return d.astype(np.float32)


def _band_size(n: int, step: int) -> int:
    """Largest multiple of `step` that divides n and is <= 256 (else n itself).

    Used to size the block-diagonal DCT band so matmuls stay near MXU-native
    size without wasting block-diagonal FLOPs.  step=8 for the sublane (row)
    side; step=128 for the lane (column) side so band slices stay tile-aligned.
    """
    if n <= 256:
        return n
    best = None
    c = step
    while c <= 256:
        if n % c == 0:
            best = c
        c += step
    return best if best is not None else n


def _build_params(h: int, w: int, size: int, quality: int):
    """Output geometry + all constant operands (bf16 MXU matrices, f32 q tables)."""
    # torchvision F.resize(int) semantics: smaller edge -> `size`, keep aspect.
    if h <= w:
        out_h, out_w = int(size), int(round(size * w / h))
    else:
        out_h, out_w = int(round(size * h / w)), int(size)
    assert out_h % 8 == 0 and out_w % 8 == 0, \
        "JPEG-sim requires output sizes divisible by 8"

    hp = ((h + 7) // 8) * 8          # pad input rows to a sublane-tile multiple

    rh_np = np.zeros((out_h, hp), dtype=np.float32)
    rh_np[:, :h] = _pil_bilinear_resize_matrix(h, out_h)
    rh = jnp.asarray(rh_np, dtype=jnp.bfloat16)                                 # (out_h, hp)
    rwt = jnp.asarray(_pil_bilinear_resize_matrix(w, out_w).T, jnp.bfloat16)    # (w, out_w)

    tbh = _band_size(out_h, 8)       # row-side DCT band (sublane slices: any x8)
    tbw = _band_size(out_w, 128)     # col-side DCT band (lane slices: x128 only)
    d8 = _dct8_matrix()
    bdh = jnp.asarray(np.kron(np.eye(tbh // 8, dtype=np.float32), d8), jnp.bfloat16)
    bdw = jnp.asarray(np.kron(np.eye(tbw // 8, dtype=np.float32), d8), jnp.bfloat16)
    # NOTE: BDH^T / BDW^T are never shipped — transposed contractions are
    # expressed with lax.dot_general dimension_numbers inside the kernel.

    qy = _quality_scaled_table(_JPEG_LUMA_Q, quality)
    qc = _quality_scaled_table(_JPEG_CHROMA_Q, quality)
    wreps = out_w // 8
    qy8 = jnp.asarray(np.tile(qy, (1, wreps)))                                  # (8, out_w)
    qc8 = jnp.asarray(np.tile(qc, (1, wreps)))
    qyi8 = jnp.asarray(np.tile((1.0 / qy).astype(np.float32), (1, wreps)))
    qci8 = jnp.asarray(np.tile((1.0 / qc).astype(np.float32), (1, wreps)))

    params = (rh, rwt, bdh, bdw, qy8, qyi8, qc8, qci8)
    meta = dict(out_h=out_h, out_w=out_w, hp=hp, tbh=tbh, tbw=tbw)
    return meta, params


# ----------------------------------------------------------------------------
# Shared math (used by the Pallas kernel body and by the pure-JAX reference)
# ----------------------------------------------------------------------------
_F32, _BF16 = jnp.float32, jnp.bfloat16


def _banded_left(bd, x, tb, *, transpose):
    """(block-diag of `bd`) @ x, or its transpose @ x.  x: (R, W), R % tb == 0."""
    nb = x.shape[0] // tb
    tn = (((0,), (0,)), ((), ()))      # contract lhs dim0 with rhs dim0 -> BD^T @ x
    outs = []
    for i in range(nb):
        band = x[i * tb:(i + 1) * tb, :].astype(_BF16)
        if transpose:
            outs.append(lax.dot_general(bd, band, tn, preferred_element_type=_F32))
        else:
            outs.append(jnp.dot(bd, band, preferred_element_type=_F32))
    return outs[0] if nb == 1 else jnp.concatenate(outs, axis=0)


def _banded_right(x, bd, tb, *, transpose):
    """x @ (block-diag of `bd`), or x @ its transpose.  x: (R, W), W % tb == 0."""
    nb = x.shape[1] // tb
    nt = (((1,), (1,)), ((), ()))      # contract lhs dim1 with rhs dim1 -> x @ BD^T
    outs = []
    for j in range(nb):
        band = x[:, j * tb:(j + 1) * tb].astype(_BF16)
        if transpose:
            outs.append(lax.dot_general(band, bd, nt, preferred_element_type=_F32))
        else:
            outs.append(jnp.dot(band, bd, preferred_element_type=_F32))
    return outs[0] if nb == 1 else jnp.concatenate(outs, axis=1)


def _fused_math(x_rows, rh, rwt, bdh, bdw, qy8, qyi8, qc8, qci8,
                *, hp, out_h, out_w, tbh, tbw):
    """Fused resize + JPEG round trip.

    x_rows : (3*hp, Win) bf16, RGB channels stacked along rows (sublane axis),
             rows padded with zeros to hp (a multiple of 8).
    rh     : (out_h, hp)  bf16 vertical resize matrix (padded columns are 0).
    rwt    : (Win, out_w) bf16 horizontal resize matrix (pre-transposed).
    bdh    : (tbh, tbh)   bf16 block-diag 8x8 DCT band (row side).
    bdw    : (tbw, tbw)   bf16 block-diag 8x8 DCT band (column side).
    q*8    : (8, out_w)   f32 quantization tables / reciprocals (one MCU row).
    """
    u8 = lambda v: jnp.clip(jnp.round(v), 0.0, 255.0)   # emulate uint8 stages

    # ---- antialiased bilinear resize ---------------------------------------
    # Horizontal pass batched over all 3 channels: one lane-dense MXU matmul.
    tmph = jnp.dot(x_rows.astype(_BF16), rwt, preferred_element_type=_F32)   # (3*hp, out_w)

    def vresize(c):   # vertical pass per channel (hp-aligned sublane slices)
        band = tmph[c * hp:(c + 1) * hp, :].astype(_BF16)                    # (hp, out_w)
        return jnp.dot(rh, band, preferred_element_type=_F32)                # (out_h, out_w)

    r, g, b = u8(vresize(0)), u8(vresize(1)), u8(vresize(2))

    # ---- JPEG round trip ----------------------------------------------------
    # RGB -> YCbCr (JFIF); encoder stores uint8 planes (no chroma subsampling).
    y = u8(0.299 * r + 0.587 * g + 0.114 * b)
    cb = u8(-0.168736 * r - 0.331264 * g + 0.5 * b + 128.0)
    cr = u8(0.5 * r - 0.418688 * g - 0.081312 * b + 128.0)

    # Stack Y/Cb/Cr along the sublane axis -> one tall slab, fewer/taller matmuls.
    ycc = jnp.concatenate([y, cb, cr], axis=0) - 128.0                       # (3*out_h, out_w)

    t = _banded_left(bdh, ycc, tbh, transpose=False)     # BD_H . C   (band-tiled)
    d = _banded_right(t, bdw, tbw, transpose=True)       # ...  . BD_W^T

    # Quantize / dequantize with tiny (8, out_w) tables broadcast over 8-row blocks.
    def qdq(ch, q8, qi8):
        blk = d[ch * out_h:(ch + 1) * out_h, :].reshape(out_h // 8, 8, out_w)
        dq = jnp.round(blk * qi8[None]) * q8[None]
        return dq.reshape(out_h, out_w)

    dq = jnp.concatenate([qdq(0, qy8, qyi8), qdq(1, qc8, qci8), qdq(2, qc8, qci8)],
                         axis=0)                                             # (3*out_h, out_w)

    t2 = _banded_left(bdh, dq, tbh, transpose=True)      # BD_H^T . DQ  (no bdht operand)
    rec = _banded_right(t2, bdw, tbw, transpose=False) + 128.0               # ... . BD_W

    # Decoder clamps IDCT output to uint8 before color conversion.
    y2 = u8(rec[0:out_h, :])
    cb2 = u8(rec[out_h:2 * out_h, :])
    cr2 = u8(rec[2 * out_h:3 * out_h, :])

    # YCbCr -> RGB; decoder emits uint8.
    r2 = u8(y2 + 1.402 * (cr2 - 128.0))
    g2 = u8(y2 - 0.344136 * (cb2 - 128.0) - 0.714136 * (cr2 - 128.0))
    b2 = u8(y2 + 1.772 * (cb2 - 128.0))
    return r2, g2, b2


# ----------------------------------------------------------------------------
# Pallas kernel (one grid step == one image)
# ----------------------------------------------------------------------------
def _fused_resize_jpeg_kernel(x_ref, rh_ref, rwt_ref, bdh_ref, bdw_ref,
                              qy_ref, qyi_ref, qc_ref, qci_ref, out_ref,
                              *, hp, out_h, out_w, tbh, tbw):
    r2, g2, b2 = _fused_math(
        x_ref[0], rh_ref[...], rwt_ref[...], bdh_ref[...], bdw_ref[...],
        qy_ref[...], qyi_ref[...], qc_ref[...], qci_ref[...],
        hp=hp, out_h=out_h, out_w=out_w, tbh=tbh, tbw=tbw)
    out_ref[0, 0] = r2
    out_ref[0, 1] = g2
    out_ref[0, 2] = b2


# ----------------------------------------------------------------------------
# Wrapper (ResizeAndJPEGinMemory.forward equivalent; supports a batch)
# ----------------------------------------------------------------------------
def resize_and_jpeg_in_memory(img: jax.Array, size: int, quality: int = 95) -> jax.Array:
    """img: (3, H, W) or (B, 3, H, W) float32 in [0, 255]."""
    squeeze = (img.ndim == 3)
    if squeeze:
        img = img[None]
    bsz, c, h, w = img.shape
    assert c == 3, "expects RGB images in CHW layout"

    meta, params = _build_params(h, w, size, quality)
    out_h, out_w, hp = meta["out_h"], meta["out_w"], meta["hp"]
    tbh, tbw = meta["tbh"], meta["tbw"]

    # bf16 input: halves input HBM/VMEM traffic; integer pixel values <= 255
    # are exact in bf16.  Rows padded to a sublane-tile multiple so in-kernel
    # per-channel slices are zero-cost views.
    img_p = jnp.pad(img.astype(jnp.bfloat16), ((0, 0), (0, 0), (0, hp - h), (0, 0)))
    x = img_p.reshape(bsz, 3 * hp, w)

    kernel = functools.partial(_fused_resize_jpeg_kernel,
                               hp=hp, out_h=out_h, out_w=out_w, tbh=tbh, tbw=tbw)

    in_specs = [pl.BlockSpec((1, 3 * hp, w), lambda b: (b, 0, 0))] + \
               [pl.BlockSpec(tuple(p.shape), lambda b, nd=p.ndim: (0,) * nd)
                for p in params]
    out_spec = pl.BlockSpec((1, 3, out_h, out_w), lambda b: (b, 0, 0, 0))

    # VMEM budget: double-buffered operands + output, plus headroom for the
    # f32 elementwise / DCT temporaries of one image.
    bytes_in = int(np.prod(x.shape[1:])) * 2
    bytes_params = sum(int(p.size) * p.dtype.itemsize for p in params)
    bytes_out = 3 * out_h * out_w * 4
    est = 2 * (bytes_in + bytes_params + bytes_out) \
        + 24 * 3 * out_h * out_w * 4 + 4 * 3 * hp * out_w * 4
    vmem_limit = int(min(64 * 1024 * 1024, max(32 * 1024 * 1024, est)))

    out = pl.pallas_call(
        kernel,
        out_shape=jax.ShapeDtypeStruct((bsz, 3, out_h, out_w), jnp.float32),
        grid=(bsz,),
        in_specs=in_specs,
        out_specs=out_spec,
        compiler_params=pltpu.CompilerParams(
            dimension_semantics=("parallel",),
            vmem_limit_bytes=vmem_limit),
    )(x, *params)
    return out[0] if squeeze else out


def _reference_forward(img: jax.Array, size: int, quality: int = 95) -> jax.Array:
    """Pure-JAX (non-Pallas) reference with identical math, for validation."""
    c, h, w = img.shape
    meta, params = _build_params(h, w, size, quality)
    hp = meta["hp"]
    img_p = jnp.pad(img.astype(jnp.bfloat16), ((0, 0), (0, hp - h), (0, 0)))
    x_rows = img_p.reshape(3 * hp, w)
    r2, g2, b2 = _fused_math(x_rows, *params, hp=hp, out_h=meta["out_h"],
                             out_w=meta["out_w"], tbh=meta["tbh"], tbw=meta["tbw"])
    return jnp.stack([r2, g2, b2], axis=0)


if __name__ == "__main__":
    key = jax.random.PRNGKey(0)
    B, H, W = 2, 24, 48                # rectangular input; smaller edge 24 -> 16
    SIZE, QUALITY = 16, 95             # module defaults: quality=95
    imgs = jax.random.uniform(key, (B, 3, H, W), jnp.float32, 0.0, 255.0)

    out = resize_and_jpeg_in_memory(imgs, size=SIZE, quality=QUALITY)
    out = jax.block_until_ready(out)

    assert out.shape == (B, 3, 16, 32)
    assert out.dtype == jnp.float32
    assert bool(jnp.all(jnp.isfinite(out)))
    assert bool(jnp.all(out >= 0.0)) and bool(jnp.all(out <= 255.0))

    # Single-image (module-like) path.
    out1 = jax.block_until_ready(
        resize_and_jpeg_in_memory(imgs[0], size=SIZE, quality=QUALITY))
    assert out1.shape == (3, 16, 32)

    # Validate the Pallas kernel against the pure-JAX reference (loose bounds:
    # quantization-bin flips near rounding boundaries cause small local diffs).
    for b in range(B):
        ref = jax.block_until_ready(_reference_forward(imgs[b], SIZE, QUALITY))
        diff = jnp.abs(out[b] - ref)
        assert float(jnp.mean(diff)) < 2.0, float(jnp.mean(diff))
        assert float(jnp.max(diff)) < 32.0, float(jnp.max(diff))

    print("KERNEL_OK")
</pallas_src>

<mosaic_0001>
module attributes {stable_mosaic.version = 11 : i64} {
  func.func @_fused_resize_jpeg_kernel(%arg0: i32, %arg1: memref<1x72x48xbf16, #tpu.memory_space<vmem>>, %arg2: memref<16x24xbf16, #tpu.memory_space<vmem>>, %arg3: memref<48x32xbf16, #tpu.memory_space<vmem>>, %arg4: memref<16x16xbf16, #tpu.memory_space<vmem>>, %arg5: memref<32x32xbf16, #tpu.memory_space<vmem>>, %arg6: memref<8x32xf32, #tpu.memory_space<vmem>>, %arg7: memref<8x32xf32, #tpu.memory_space<vmem>>, %arg8: memref<8x32xf32, #tpu.memory_space<vmem>>, %arg9: memref<8x32xf32, #tpu.memory_space<vmem>>, %arg10: memref<1x3x16x32xf32, #tpu.memory_space<vmem>>) attributes {dimension_semantics = [#tpu.dimension_semantics<parallel>], iteration_bounds = array<i64: 2>, scalar_prefetch = 0 : i64, scratch_operands = 0 : i64, tpu.core_type = #tpu.core_type<tc>, window_params = [{transform_indices = @transform_0, window_bounds = array<i64: 1, 72, 48>}, {pipeline_mode = #tpu.pipeline_mode<synchronous>, transform_indices = @transform_1, window_bounds = array<i64: 16, 24>}, {pipeline_mode = #tpu.pipeline_mode<synchronous>, transform_indices = @transform_2, window_bounds = array<i64: 48, 32>}, {pipeline_mode = #tpu.pipeline_mode<synchronous>, transform_indices = @transform_3, window_bounds = array<i64: 16, 16>}, {pipeline_mode = #tpu.pipeline_mode<synchronous>, transform_indices = @transform_4, window_bounds = array<i64: 32, 32>}, {pipeline_mode = #tpu.pipeline_mode<synchronous>, transform_indices = @transform_5, window_bounds = array<i64: 8, 32>}, {pipeline_mode = #tpu.pipeline_mode<synchronous>, transform_indices = @transform_6, window_bounds = array<i64: 8, 32>}, {pipeline_mode = #tpu.pipeline_mode<synchronous>, transform_indices = @transform_7, window_bounds = array<i64: 8, 32>}, {pipeline_mode = #tpu.pipeline_mode<synchronous>, transform_indices = @transform_8, window_bounds = array<i64: 8, 32>}, {transform_indices = @transform_9, window_bounds = array<i64: 1, 3, 16, 32>}]} {
    %c0 = arith.constant 0 : index
    %c0_0 = arith.constant 0 : index
    %c0_1 = arith.constant 0 : index
    %0 = vector.load %arg1[%c0, %c0_0, %c0_1] : memref<1x72x48xbf16, #tpu.memory_space<vmem>>, vector<1x72x48xbf16>
    %1 = vector.shape_cast %0 : vector<1x72x48xbf16> to vector<72x48xbf16>
    %c0_2 = arith.constant 0 : index
    %c0_3 = arith.constant 0 : index
    %2 = vector.load %arg2[%c0_2, %c0_3] : memref<16x24xbf16, #tpu.memory_space<vmem>>, vector<16x24xbf16>
    %c0_4 = arith.constant 0 : index
    %c0_5 = arith.constant 0 : index
    %3 = vector.load %arg3[%c0_4, %c0_5] : memref<48x32xbf16, #tpu.memory_space<vmem>>, vector<48x32xbf16>
    %c0_6 = arith.constant 0 : index
    %c0_7 = arith.constant 0 : index
    %4 = vector.load %arg4[%c0_6, %c0_7] : memref<16x16xbf16, #tpu.memory_space<vmem>>, vector<16x16xbf16>
    %c0_8 = arith.constant 0 : index
    %c0_9 = arith.constant 0 : index
    %5 = vector.load %arg5[%c0_8, %c0_9] : memref<32x32xbf16, #tpu.memory_space<vmem>>, vector<32x32xbf16>
    %c0_10 = arith.constant 0 : index
    %c0_11 = arith.constant 0 : index
    %6 = vector.load %arg6[%c0_10, %c0_11] : memref<8x32xf32, #tpu.memory_space<vmem>>, vector<8x32xf32>
    %c0_12 = arith.constant 0 : index
    %c0_13 = arith.constant 0 : index
    %7 = vector.load %arg7[%c0_12, %c0_13] : memref<8x32xf32, #tpu.memory_space<vmem>>, vector<8x32xf32>
    %c0_14 = arith.constant 0 : index
    %c0_15 = arith.constant 0 : index
    %8 = vector.load %arg8[%c0_14, %c0_15] : memref<8x32xf32, #tpu.memory_space<vmem>>, vector<8x32xf32>
    %c0_16 = arith.constant 0 : index
    %c0_17 = arith.constant 0 : index
    %9 = vector.load %arg9[%c0_16, %c0_17] : memref<8x32xf32, #tpu.memory_space<vmem>>, vector<8x32xf32>
    %cst = arith.constant dense<0.000000e+00> : vector<72x32xf32>
    %10 = tpu.matmul %1, %3, %cst {dimension_numbers = #tpu.dot_dimension_numbers<[1], [0], [0], [1], [0, 0, 1, 1], [], []>} : vector<72x48xbf16>, vector<48x32xbf16>, vector<72x32xf32> -> vector<72x32xf32>
    %11 = vector.extract_strided_slice %10 {offsets = [0, 0], sizes = [24, 32], strides = [1, 1]} : vector<72x32xf32> to vector<24x32xf32>
    %12 = arith.truncf %11 : vector<24x32xf32> to vector<24x32xbf16>
    %cst_18 = arith.constant dense<0.000000e+00> : vector<16x32xf32>
    %13 = tpu.matmul %2, %12, %cst_18 {dimension_numbers = #tpu.dot_dimension_numbers<[1], [0], [0], [1], [0, 0, 1, 1], [], []>} : vector<16x24xbf16>, vector<24x32xbf16>, vector<16x32xf32> -> vector<16x32xf32>
    %14 = math.roundeven %13 : vector<16x32xf32>
    %cst_19 = arith.constant 0.000000e+00 : f32
    %cst_20 = arith.constant 2.550000e+02 : f32
    %15 = vector.broadcast %cst_19 : f32 to vector<16x32xf32>
    %16 = arith.maximumf %15, %14 : vector<16x32xf32>
    %17 = vector.broadcast %cst_20 : f32 to vector<16x32xf32>
    %18 = arith.minimumf %17, %16 : vector<16x32xf32>
    %19 = vector.extract_strided_slice %10 {offsets = [24, 0], sizes = [24, 32], strides = [1, 1]} : vector<72x32xf32> to vector<24x32xf32>
    %20 = arith.truncf %19 : vector<24x32xf32> to vector<24x32xbf16>
    %cst_21 = arith.constant dense<0.000000e+00> : vector<16x32xf32>
    %21 = tpu.matmul %2, %20, %cst_21 {dimension_numbers = #tpu.dot_dimension_numbers<[1], [0], [0], [1], [0, 0, 1, 1], [], []>} : vector<16x24xbf16>, vector<24x32xbf16>, vector<16x32xf32> -> vector<16x32xf32>
    %22 = math.roundeven %21 : vector<16x32xf32>
    %cst_22 = arith.constant 0.000000e+00 : f32
    %cst_23 = arith.constant 2.550000e+02 : f32
    %23 = vector.broadcast %cst_22 : f32 to vector<16x32xf32>
    %24 = arith.maximumf %23, %22 : vector<16x32xf32>
    %25 = vector.broadcast %cst_23 : f32 to vector<16x32xf32>
    %26 = arith.minimumf %25, %24 : vector<16x32xf32>
    %27 = vector.extract_strided_slice %10 {offsets = [48, 0], sizes = [24, 32], strides = [1, 1]} : vector<72x32xf32> to vector<24x32xf32>
    %28 = arith.truncf %27 : vector<24x32xf32> to vector<24x32xbf16>
    %cst_24 = arith.constant dense<0.000000e+00> : vector<16x32xf32>
    %29 = tpu.matmul %2, %28, %cst_24 {dimension_numbers = #tpu.dot_dimension_numbers<[1], [0], [0], [1], [0, 0, 1, 1], [], []>} : vector<16x24xbf16>, vector<24x32xbf16>, vector<16x32xf32> -> vector<16x32xf32>
    %30 = math.roundeven %29 : vector<16x32xf32>
    %cst_25 = arith.constant 0.000000e+00 : f32
    %cst_26 = arith.constant 2.550000e+02 : f32
    %31 = vector.broadcast %cst_25 : f32 to vector<16x32xf32>
    %32 = arith.maximumf %31, %30 : vector<16x32xf32>
    %33 = vector.broadcast %cst_26 : f32 to vector<16x32xf32>
    %34 = arith.minimumf %33, %32 : vector<16x32xf32>
    %cst_27 = arith.constant 2.990000e-01 : f32
    %35 = vector.broadcast %cst_27 : f32 to vector<16x32xf32>
    %36 = arith.mulf %35, %18 : vector<16x32xf32>
    %cst_28 = arith.constant 5.870000e-01 : f32
    %37 = vector.broadcast %cst_28 : f32 to vector<16x32xf32>
    %38 = arith.mulf %37, %26 : vector<16x32xf32>
    %39 = arith.addf %36, %38 : vector<16x32xf32>
    %cst_29 = arith.constant 1.140000e-01 : f32
    %40 = vector.broadcast %cst_29 : f32 to vector<16x32xf32>
    %41 = arith.mulf %40, %34 : vector<16x32xf32>
    %42 = arith.addf %39, %41 : vector<16x32xf32>
    %43 = math.roundeven %42 : vector<16x32xf32>
    %cst_30 = arith.constant 0.000000e+00 : f32
    %cst_31 = arith.constant 2.550000e+02 : f32
    %44 = vector.broadcast %cst_30 : f32 to vector<16x32xf32>
    %45 = arith.maximumf %44, %43 : vector<16x32xf32>
    %46 = vector.broadcast %cst_31 : f32 to vector<16x32xf32>
    %47 = arith.minimumf %46, %45 : vector<16x32xf32>
    %cst_32 = arith.constant -1.687360e-01 : f32
    %48 = vector.broadcast %cst_32 : f32 to vector<16x32xf32>
    %49 = arith.mulf %48, %18 : vector<16x32xf32>
    %cst_33 = arith.constant 3.312640e-01 : f32
    %50 = vector.broadcast %cst_33 : f32 to vector<16x32xf32>
    %51 = arith.mulf %50, %26 : vector<16x32xf32>
    %52 = arith.subf %49, %51 : vector<16x32xf32>
    %cst_34 = arith.constant 5.000000e-01 : f32
    %53 = vector.broadcast %cst_34 : f32 to vector<16x32xf32>
    %54 = arith.mulf %53, %34 : vector<16x32xf32>
    %55 = arith.addf %52, %54 : vector<16x32xf32>
    %cst_35 = arith.constant 1.280000e+02 : f32
    %56 = vector.broadcast %cst_35 : f32 to vector<16x32xf32>
    %57 = arith.addf %55, %56 : vector<16x32xf32>
    %58 = math.roundeven %57 : vector<16x32xf32>
    %cst_36 = arith.constant 0.000000e+00 : f32
    %cst_37 = arith.constant 2.550000e+02 : f32
    %59 = vector.broadcast %cst_36 : f32 to vector<16x32xf32>
    %60 = arith.maximumf %59, %58 : vector<16x32xf32>
    %61 = vector.broadcast %cst_37 : f32 to vector<16x32xf32>
    %62 = arith.minimumf %61, %60 : vector<16x32xf32>
    %cst_38 = arith.constant 5.000000e-01 : f32
    %63 = vector.broadcast %cst_38 : f32 to vector<16x32xf32>
    %64 = arith.mulf %63, %18 : vector<16x32xf32>
    %cst_39 = arith.constant 4.186880e-01 : f32
    %65 = vector.broadcast %cst_39 : f32 to vector<16x32xf32>
    %66 = arith.mulf %65, %26 : vector<16x32xf32>
    %67 = arith.subf %64, %66 : vector<16x32xf32>
    %cst_40 = arith.constant 8.131200e-02 : f32
    %68 = vector.broadcast %cst_40 : f32 to vector<16x32xf32>
    %69 = arith.mulf %68, %34 : vector<16x32xf32>
    %70 = arith.subf %67, %69 : vector<16x32xf32>
    %cst_41 = arith.constant 1.280000e+02 : f32
    %71 = vector.broadcast %cst_41 : f32 to vector<16x32xf32>
    %72 = arith.addf %70, %71 : vector<16x32xf32>
    %73 = math.roundeven %72 : vector<16x32xf32>
    %cst_42 = arith.constant 0.000000e+00 : f32
    %cst_43 = arith.constant 2.550000e+02 : f32
    %74 = vector.broadcast %cst_42 : f32 to vector<16x32xf32>
    %75 = arith.maximumf %74, %73 : vector<16x32xf32>
    %76 = vector.broadcast %cst_43 : f32 to vector<16x32xf32>
    %77 = arith.minimumf %76, %75 : vector<16x32xf32>
    %78 = tpu.concatenate %47, %62, %77 in 0 : vector<16x32xf32>, vector<16x32xf32>, vector<16x32xf32> -> vector<48x32xf32>
    %cst_44 = arith.constant 1.280000e+02 : f32
    %79 = vector.broadcast %cst_44 : f32 to vector<48x32xf32>
    %80 = arith.subf %78, %79 : vector<48x32xf32>
    %81 = vector.extract_strided_slice %80 {offsets = [0, 0], sizes = [16, 32], strides = [1, 1]} : vector<48x32xf32> to vector<16x32xf32>
    %82 = arith.truncf %81 : vector<16x32xf32> to vector<16x32xbf16>
    %cst_45 = arith.constant dense<0.000000e+00> : vector<16x32xf32>
    %83 = tpu.matmul %4, %82, %cst_45 {dimension_numbers = #tpu.dot_dimension_numbers<[1], [0], [0], [1], [0, 0, 1, 1], [], []>} : vector<16x16xbf16>, vector<16x32xbf16>, vector<16x32xf32> -> vector<16x32xf32>
    %84 = vector.extract_strided_slice %80 {offsets = [16, 0], sizes = [16, 32], strides = [1, 1]} : vector<48x32xf32> to vector<16x32xf32>
    %85 = arith.truncf %84 : vector<16x32xf32> to vector<16x32xbf16>
    %cst_46 = arith.constant dense<0.000000e+00> : vector<16x32xf32>
    %86 = tpu.matmul %4, %85, %cst_46 {dimension_numbers = #tpu.dot_dimension_numbers<[1], [0], [0], [1], [0, 0, 1, 1], [], []>} : vector<16x16xbf16>, vector<16x32xbf16>, vector<16x32xf32> -> vector<16x32xf32>
    %87 = vector.extract_strided_slice %80 {offsets = [32, 0], sizes = [16, 32], strides = [1, 1]} : vector<48x32xf32> to vector<16x32xf32>
    %88 = arith.truncf %87 : vector<16x32xf32> to vector<16x32xbf16>
    %cst_47 = arith.constant dense<0.000000e+00> : vector<16x32xf32>
    %89 = tpu.matmul %4, %88, %cst_47 {dimension_numbers = #tpu.dot_dimension_numbers<[1], [0], [0], [1], [0, 0, 1, 1], [], []>} : vector<16x16xbf16>, vector<16x32xbf16>, vector<16x32xf32> -> vector<16x32xf32>
    %90 = tpu.concatenate %83, %86, %89 in 0 : vector<16x32xf32>, vector<16x32xf32>, vector<16x32xf32> -> vector<48x32xf32>
    %91 = arith.truncf %90 : vector<48x32xf32> to vector<48x32xbf16>
    %cst_48 = arith.constant dense<0.000000e+00> : vector<48x32xf32>
    %92 = tpu.matmul %91, %5, %cst_48 {dimension_numbers = #tpu.dot_dimension_numbers<[1], [1], [0], [0], [0, 0, 1, 0], [], []>} : vector<48x32xbf16>, vector<32x32xbf16>, vector<48x32xf32> -> vector<48x32xf32>
    %93 = vector.extract_strided_slice %92 {offsets = [0, 0], sizes = [16, 32], strides = [1, 1]} : vector<48x32xf32> to vector<16x32xf32>
    %94 = vector.shape_cast %93 : vector<16x32xf32> to vector<2x8x32xf32>
    %95 = vector.shape_cast %7 : vector<8x32xf32> to vector<1x8x32xf32>
    %96 = vector.broadcast %95 : vector<1x8x32xf32> to vector<2x8x32xf32>
    %97 = arith.mulf %94, %96 : vector<2x8x32xf32>
    %98 = math.roundeven %97 : vector<2x8x32xf32>
    %99 = vector.shape_cast %6 : vector<8x32xf32> to vector<1x8x32xf32>
    %100 = vector.broadcast %99 : vector<1x8x32xf32> to vector<2x8x32xf32>
    %101 = arith.mulf %98, %100 : vector<2x8x32xf32>
    %102 = vector.shape_cast %101 : vector<2x8x32xf32> to vector<16x32xf32>
    %103 = vector.extract_strided_slice %92 {offsets = [16, 0], sizes = [16, 32], strides = [1, 1]} : vector<48x32xf32> to vector<16x32xf32>
    %104 = vector.shape_cast %103 : vector<16x32xf32> to vector<2x8x32xf32>
    %105 = vector.shape_cast %9 : vector<8x32xf32> to vector<1x8x32xf32>
    %106 = vector.broadcast %105 : vector<1x8x32xf32> to vector<2x8x32xf32>
    %107 = arith.mulf %104, %106 : vector<2x8x32xf32>
    %108 = math.roundeven %107 : vector<2x8x32xf32>
    %109 = vector.shape_cast %8 : vector<8x32xf32> to vector<1x8x32xf32>
    %110 = vector.broadcast %109 : vector<1x8x32xf32> to vector<2x8x32xf32>
    %111 = arith.mulf %108, %110 : vector<2x8x32xf32>
    %112 = vector.shape_cast %111 : vector<2x8x32xf32> to vector<16x32xf32>
    %113 = vector.extract_strided_slice %92 {offsets = [32, 0], sizes = [16, 32], strides = [1, 1]} : vector<48x32xf32> to vector<16x32xf32>
    %114 = vector.shape_cast %113 : vector<16x32xf32> to vector<2x8x32xf32>
    %115 = vector.shape_cast %9 : vector<8x32xf32> to vector<1x8x32xf32>
    %116 = vector.broadcast %115 : vector<1x8x32xf32> to vector<2x8x32xf32>
    %117 = arith.mulf %114, %116 : vector<2x8x32xf32>
    %118 = math.roundeven %117 : vector<2x8x32xf32>
    %119 = vector.shape_cast %8 : vector<8x32xf32> to vector<1x8x32xf32>
    %120 = vector.broadcast %119 : vector<1x8x32xf32> to vector<2x8x32xf32>
    %121 = arith.mulf %118, %120 : vector<2x8x32xf32>
    %122 = vector.shape_cast %121 : vector<2x8x32xf32> to vector<16x32xf32>
    %123 = tpu.concatenate %102, %112, %122 in 0 : vector<16x32xf32>, vector<16x32xf32>, vector<16x32xf32> -> vector<48x32xf32>
    %124 = vector.extract_strided_slice %123 {offsets = [0, 0], sizes = [16, 32], strides = [1, 1]} : vector<48x32xf32> to vector<16x32xf32>
    %125 = arith.truncf %124 : vector<16x32xf32> to vector<16x32xbf16>
    %cst_49 = arith.constant dense<0.000000e+00> : vector<16x32xf32>
    %126 = tpu.matmul %4, %125, %cst_49 {dimension_numbers = #tpu.dot_dimension_numbers<[0], [0], [1], [1], [0, 1, 1, 1], [], []>} : vector<16x16xbf16>, vector<16x32xbf16>, vector<16x32xf32> -> vector<16x32xf32>
    %127 = vector.extract_strided_slice %123 {offsets = [16, 0], sizes = [16, 32], strides = [1, 1]} : vector<48x32xf32> to vector<16x32xf32>
    %128 = arith.truncf %127 : vector<16x32xf32> to vector<16x32xbf16>
    %cst_50 = arith.constant dense<0.000000e+00> : vector<16x32xf32>
    %129 = tpu.matmul %4, %128, %cst_50 {dimension_numbers = #tpu.dot_dimension_numbers<[0], [0], [1], [1], [0, 1, 1, 1], [], []>} : vector<16x16xbf16>, vector<16x32xbf16>, vector<16x32xf32> -> vector<16x32xf32>
    %130 = vector.extract_strided_slice %123 {offsets = [32, 0], sizes = [16, 32], strides = [1, 1]} : vector<48x32xf32> to vector<16x32xf32>
    %131 = arith.truncf %130 : vector<16x32xf32> to vector<16x32xbf16>
    %cst_51 = arith.constant dense<0.000000e+00> : vector<16x32xf32>
    %132 = tpu.matmul %4, %131, %cst_51 {dimension_numbers = #tpu.dot_dimension_numbers<[0], [0], [1], [1], [0, 1, 1, 1], [], []>} : vector<16x16xbf16>, vector<16x32xbf16>, vector<16x32xf32> -> vector<16x32xf32>
    %133 = tpu.concatenate %126, %129, %132 in 0 : vector<16x32xf32>, vector<16x32xf32>, vector<16x32xf32> -> vector<48x32xf32>
    %134 = arith.truncf %133 : vector<48x32xf32> to vector<48x32xbf16>
    %cst_52 = arith.constant dense<0.000000e+00> : vector<48x32xf32>
    %135 = tpu.matmul %134, %5, %cst_52 {dimension_numbers = #tpu.dot_dimension_numbers<[1], [0], [0], [1], [0, 0, 1, 1], [], []>} : vector<48x32xbf16>, vector<32x32xbf16>, vector<48x32xf32> -> vector<48x32xf32>
    %cst_53 = arith.constant 1.280000e+02 : f32
    %136 = vector.broadcast %cst_53 : f32 to vector<48x32xf32>
    %137 = arith.addf %135, %136 : vector<48x32xf32>
    %138 = vector.extract_strided_slice %137 {offsets = [0, 0], sizes = [16, 32], strides = [1, 1]} : vector<48x32xf32> to vector<16x32xf32>
    %139 = math.roundeven %138 : vector<16x32xf32>
    %cst_54 = arith.constant 0.000000e+00 : f32
    %cst_55 = arith.constant 2.550000e+02 : f32
    %140 = vector.broadcast %cst_54 : f32 to vector<16x32xf32>
    %141 = arith.maximumf %140, %139 : vector<16x32xf32>
    %142 = vector.broadcast %cst_55 : f32 to vector<16x32xf32>
    %143 = arith.minimumf %142, %141 : vector<16x32xf32>
    %144 = vector.extract_strided_slice %137 {offsets = [16, 0], sizes = [16, 32], strides = [1, 1]} : vector<48x32xf32> to vector<16x32xf32>
    %145 = math.roundeven %144 : vector<16x32xf32>
    %cst_56 = arith.constant 0.000000e+00 : f32
    %cst_57 = arith.constant 2.550000e+02 : f32
    %146 = vector.broadcast %cst_56 : f32 to vector<16x32xf32>
    %147 = arith.maximumf %146, %145 : vector<16x32xf32>
    %148 = vector.broadcast %cst_57 : f32 to vector<16x32xf32>
    %149 = arith.minimumf %148, %147 : vector<16x32xf32>
    %150 = vector.extract_strided_slice %137 {offsets = [32, 0], sizes = [16, 32], strides = [1, 1]} : vector<48x32xf32> to vector<16x32xf32>
    %151 = math.roundeven %150 : vector<16x32xf32>
    %cst_58 = arith.constant 0.000000e+00 : f32
    %cst_59 = arith.constant 2.550000e+02 : f32
    %152 = vector.broadcast %cst_58 : f32 to vector<16x32xf32>
    %153 = arith.maximumf %152, %151 : vector<16x32xf32>
    %154 = vector.broadcast %cst_59 : f32 to vector<16x32xf32>
    %155 = arith.minimumf %154, %153 : vector<16x32xf32>
    %cst_60 = arith.constant 1.280000e+02 : f32
    %156 = vector.broadcast %cst_60 : f32 to vector<16x32xf32>
    %157 = arith.subf %155, %156 : vector<16x32xf32>
    %cst_61 = arith.constant 1.402000e+00 : f32
    %158 = vector.broadcast %cst_61 : f32 to vector<16x32xf32>
    %159 = arith.mulf %158, %157 : vector<16x32xf32>
    %160 = arith.addf %143, %159 : vector<16x32xf32>
    %161 = math.roundeven %160 : vector<16x32xf32>
    %cst_62 = arith.constant 0.000000e+00 : f32
    %cst_63 = arith.constant 2.550000e+02 : f32
    %162 = vector.broadcast %cst_62 : f32 to vector<16x32xf32>
    %163 = arith.maximumf %162, %161 : vector<16x32xf32>
    %164 = vector.broadcast %cst_63 : f32 to vector<16x32xf32>
    %165 = arith.minimumf %164, %163 : vector<16x32xf32>
    %cst_64 = arith.constant 1.280000e+02 : f32
    %166 = vector.broadcast %cst_64 : f32 to vector<16x32xf32>
    %167 = arith.subf %149, %166 : vector<16x32xf32>
    %cst_65 = arith.constant 3.441360e-01 : f32
    %168 = vector.broadcast %cst_65 : f32 to vector<16x32xf32>
    %169 = arith.mulf %168, %167 : vector<16x32xf32>
    %170 = arith.subf %143, %169 : vector<16x32xf32>
    %cst_66 = arith.constant 1.280000e+02 : f32
    %171 = vector.broadcast %cst_66 : f32 to vector<16x32xf32>
    %172 = arith.subf %155, %171 : vector<16x32xf32>
    %cst_67 = arith.constant 7.141360e-01 : f32
    %173 = vector.broadcast %cst_67 : f32 to vector<16x32xf32>
    %174 = arith.mulf %173, %172 : vector<16x32xf32>
    %175 = arith.subf %170, %174 : vector<16x32xf32>
    %176 = math.roundeven %175 : vector<16x32xf32>
    %cst_68 = arith.constant 0.000000e+00 : f32
    %cst_69 = arith.constant 2.550000e+02 : f32
    %177 = vector.broadcast %cst_68 : f32 to vector<16x32xf32>
    %178 = arith.maximumf %177, %176 : vector<16x32xf32>
    %179 = vector.broadcast %cst_69 : f32 to vector<16x32xf32>
    %180 = arith.minimumf %179, %178 : vector<16x32xf32>
    %cst_70 = arith.constant 1.280000e+02 : f32
    %181 = vector.broadcast %cst_70 : f32 to vector<16x32xf32>
    %182 = arith.subf %149, %181 : vector<16x32xf32>
    %cst_71 = arith.constant 1.772000e+00 : f32
    %183 = vector.broadcast %cst_71 : f32 to vector<16x32xf32>
    %184 = arith.mulf %183, %182 : vector<16x32xf32>
    %185 = arith.addf %143, %184 : vector<16x32xf32>
    %186 = math.roundeven %185 : vector<16x32xf32>
    %cst_72 = arith.constant 0.000000e+00 : f32
    %cst_73 = arith.constant 2.550000e+02 : f32
    %187 = vector.broadcast %cst_72 : f32 to vector<16x32xf32>
    %188 = arith.maximumf %187, %186 : vector<16x32xf32>
    %189 = vector.broadcast %cst_73 : f32 to vector<16x32xf32>
    %190 = arith.minimumf %189, %188 : vector<16x32xf32>
    %c0_74 = arith.constant 0 : index
    %c0_75 = arith.constant 0 : index
    %c0_76 = arith.constant 0 : index
    %c0_77 = arith.constant 0 : index
    %191 = vector.load %arg10[%c0_74, %c0_75, %c0_76, %c0_77] : memref<1x3x16x32xf32, #tpu.memory_space<vmem>>, vector<1x1x16x32xf32>
    %192 = vector.shape_cast %191 : vector<1x1x16x32xf32> to vector<16x32xf32>
    %193 = vector.shape_cast %165 : vector<16x32xf32> to vector<1x1x16x32xf32>
    tpu.vector_store %arg10[%c0_74, %c0_75, %c0_76, %c0_77], %193 {strides = array<i32>} : memref<1x3x16x32xf32, #tpu.memory_space<vmem>>, vector<1x1x16x32xf32>,
    %c0_78 = arith.constant 0 : index
    %c1 = arith.constant 1 : index
    %c0_79 = arith.constant 0 : index
    %c0_80 = arith.constant 0 : index
    %194 = vector.load %arg10[%c0_78, %c1, %c0_79, %c0_80] : memref<1x3x16x32xf32, #tpu.memory_space<vmem>>, vector<1x1x16x32xf32>
    %195 = vector.shape_cast %194 : vector<1x1x16x32xf32> to vector<16x32xf32>
    %196 = vector.shape_cast %180 : vector<16x32xf32> to vector<1x1x16x32xf32>
    tpu.vector_store %arg10[%c0_78, %c1, %c0_79, %c0_80], %196 {strides = array<i32>} : memref<1x3x16x32xf32, #tpu.memory_space<vmem>>, vector<1x1x16x32xf32>,
    %c0_81 = arith.constant 0 : index
    %c2 = arith.constant 2 : index
    %c0_82 = arith.constant 0 : index
    %c0_83 = arith.constant 0 : index
    %197 = vector.load %arg10[%c0_81, %c2, %c0_82, %c0_83] : memref<1x3x16x32xf32, #tpu.memory_space<vmem>>, vector<1x1x16x32xf32>
    %198 = vector.shape_cast %197 : vector<1x1x16x32xf32> to vector<16x32xf32>
    %199 = vector.shape_cast %190 : vector<16x32xf32> to vector<1x1x16x32xf32>
    tpu.vector_store %arg10[%c0_81, %c2, %c0_82, %c0_83], %199 {strides = array<i32>} : memref<1x3x16x32xf32, #tpu.memory_space<vmem>>, vector<1x1x16x32xf32>,
    return
  }
  func.func @transform_0(%arg0: i32) -> (i32, i32, i32) {
    %c0_i32 = arith.constant 0 : i32
    %c0_i32_0 = arith.constant 0 : i32
    %c0_i32_1 = arith.constant 0 : i32
    return %arg0, %c0_i32, %c0_i32_0 : i32, i32, i32
  }
  func.func @transform_1(%arg0: i32) -> (i32, i32) {
    %c0_i32 = arith.constant 0 : i32
    %c0_i32_0 = arith.constant 0 : i32
    %c0_i32_1 = arith.constant 0 : i32
    return %c0_i32, %c0_i32_0 : i32, i32
  }
  func.func @transform_2(%arg0: i32) -> (i32, i32) {
    %c0_i32 = arith.constant 0 : i32
    %c0_i32_0 = arith.constant 0 : i32
    %c0_i32_1 = arith.constant 0 : i32
    return %c0_i32, %c0_i32_0 : i32, i32
  }
  func.func @transform_3(%arg0: i32) -> (i32, i32) {
    %c0_i32 = arith.constant 0 : i32
    %c0_i32_0 = arith.constant 0 : i32
    %c0_i32_1 = arith.constant 0 : i32
    return %c0_i32, %c0_i32_0 : i32, i32
  }
  func.func @transform_4(%arg0: i32) -> (i32, i32) {
    %c0_i32 = arith.constant 0 : i32
    %c0_i32_0 = arith.constant 0 : i32
    %c0_i32_1 = arith.constant 0 : i32
    return %c0_i32, %c0_i32_0 : i32, i32
  }
  func.func @transform_5(%arg0: i32) -> (i32, i32) {
    %c0_i32 = arith.constant 0 : i32
    %c0_i32_0 = arith.constant 0 : i32
    %c0_i32_1 = arith.constant 0 : i32
    return %c0_i32, %c0_i32_0 : i32, i32
  }
  func.func @transform_6(%arg0: i32) -> (i32, i32) {
    %c0_i32 = arith.constant 0 : i32
    %c0_i32_0 = arith.constant 0 : i32
    %c0_i32_1 = arith.constant 0 : i32
    return %c0_i32, %c0_i32_0 : i32, i32
  }
  func.func @transform_7(%arg0: i32) -> (i32, i32) {
    %c0_i32 = arith.constant 0 : i32
    %c0_i32_0 = arith.constant 0 : i32
    %c0_i32_1 = arith.constant 0 : i32
    return %c0_i32, %c0_i32_0 : i32, i32
  }
  func.func @transform_8(%arg0: i32) -> (i32, i32) {
    %c0_i32 = arith.constant 0 : i32
    %c0_i32_0 = arith.constant 0 : i32
    %c0_i32_1 = arith.constant 0 : i32
    return %c0_i32, %c0_i32_0 : i32, i32
  }
  func.func @transform_9(%arg0: i32) -> (i32, i32, i32, i32) {
    %c0_i32 = arith.constant 0 : i32
    %c0_i32_0 = arith.constant 0 : i32
    %c0_i32_1 = arith.constant 0 : i32
    %c0_i32_2 = arith.constant 0 : i32
    return %arg0, %c0_i32, %c0_i32_0, %c0_i32_1 : i32, i32, i32, i32
  }
}

</mosaic_0001>

<bundles_post_ra>
// kernel: tpu_custom_call.1
= control target key start
LH: loop header
LB: loop body
LE: loop exit
PB: predicated region body
PF: predicated region fallthrough
CT: control target
= control target key end

     0   :  { %14 = vsyncpa [#allocation3], 0  ;;  %s1980_s0 = inlined_call_operand.vmem [shape: bf16[2,72,48], index: 0, kind: input, shape index: {}]   ;;  %s1981_s1 = inlined_call_operand.vmem [shape: bf16[16,24], index: 1, kind: input, shape index: {}]   ;;  %s1982_s2 = inlined_call_operand.vmem [shape: bf16[48,32], index: 2, kind: input, shape index: {}]   ;;  %s1983_s3 = inlined_call_operand.vmem [shape: bf16[16,16], index: 3, kind: input, shape index: {}]   ;;  %s1984_s4 = inlined_call_operand.vmem [shape: bf16[32,32], index: 4, kind: input, shape index: {}]   ;;  %s1985_s5 = inlined_call_operand.vmem [shape: f32[8,32], index: 5, kind: input, shape index: {}]   ;;  %s1986_s6 = inlined_call_operand.vmem [shape: f32[8,32], index: 6, kind: input, shape index: {}]   ;;  %s1987_s7 = inlined_call_operand.vmem [shape: f32[8,32], index: 7, kind: input, shape index: {}]   ;;  %s1988_s8 = inlined_call_operand.vmem [shape: f32[8,32], index: 8, kind: input, shape index: {}]   ;;  %s1989_s9 = inlined_call_operand.hbm [shape: f32[2,3,16,32], index: 9, kind: output, shape index: {}]  }
   0x1   :  { %16 = vsyncpa [#allocation3 + $0x1], 0  ;;  %s1733_s30 = smov 0   ;;  %s1735_s10 = smov 0  }
   0x2   :  { %s1737_s11 = smov 0   ;;  %s1739_s12 = smov 0  }
   0x3 LB: > { %s1754_s13 = sadd.s32 4294967295, %s1676_s12   ;;  %s1308_s14 = sadd.s32 4294967294, %s1676_s12   ;;  %s1676_s12 = sphi %s1739_s12, %s1995_s12   ;;  %s1672_s11 = sphi %s1737_s11, %s1994_s11   ;;  %s1668_s10 = sphi %s1735_s10, %s1993_s10   ;;  %s1664_s30 = sphi %s1733_s30, %s1992_s30  }
   0x4   : > { %s1758_s15 = sadd.s32 1, %s1676_s12   ;;  %s223_s16 = sadd.s32 1, %s1672_s11 }
   0x5   : > { %s220_s17 = ssub.s32 %s1676_s12, %s1758_s15  ;;  %p233_p0 = scmp.ne.s32.totalorder %s1672_s11, %s1668_s10 }
   0x6   : > { %p221_p1 = scmp.eq.s32.totalorder %s220_s17, 0  ;;  %p234_p2 = scmp.eq.s32.totalorder %s1754_s13, 1 }
   0x7   : > { %p239_p3 = scmp.ne.s32.totalorder %s1668_s10, %s1664_s30  ;;  %p240_p4 = scmp.eq.s32.totalorder %s1308_s14, 1 }
   0x8   : > { %s1769_s18 = scalar_select %p221_p1, %s1672_s11, %s223_s16  }
   0x9   : > { %p1771_p5 = por %p234_p2, %p233_p0  ;;  %p1775_p6 = por %p240_p4, %p239_p3 }
   0xa   : > { %p1311_p7 = scmp.ge.s32.totalorder %s1676_s12, 1  ;;  %p290_p8 = scmp.lt.s32.totalorder %s1676_s12, 3 }
   0xc   : > { %p291_p9 = pnand %p1311_p7, %p290_p8 }
   0xd   : > { %v1602_v0 = vld [vmem:[%s1982_s2] sm:$0xff] (!%p291_p9)   ;;  %v1678_v1 = vmov (!%p291_p9), 0.0   ;;  %v1603_v2 = vld [vmem:[%s1982_s2 + $0x8] sm:$0xff] (!%p291_p9)   ;;  %vm1679_vm0 = vmmov (!%p291_p9), 0   ;;  %p326_p10 = scmp.lt.s32.totalorder (!%p291_p9), %s1754_s13, 1  ;;  %v1604_v3 = vld [vmem:[%s1982_s2 + $0x10] sm:$0xff] (!%p291_p9)  }
   0xe   : > { %294 = sbr.rel (%p291_p9) target bundleno = 1435 (0x59b), region = 56  ;;  %1401 = vmatprep.subr.bf16.mxu0 (!%p291_p9), %v1678_v1  ;;  %1519 = vmatprep.subr.bf16.mxu1 (!%p291_p9), %v1678_v1  ;;  %vm400_vm1 = vcmask (!%p291_p9), 392192   ;;  %vm499_vm2 = vcmask (!%p291_p9), 1043456   ;;  %v1610_v24 = vld [vmem:[%s1981_s1] sm:$0xff] (!%p291_p9)   ;;  %vm495_vm3 = vcmask (!%p291_p9), 195584   ;;  %vm860_vm4 = vcmask (!%p291_p9), 261120  }
   0xf   : > { %1402 = vmatpush3.bf16.msra.mxu0 (!%p291_p9), %v1602_v0  ;;  %1407 = vmatprep.mubr.msk.bf16.mxu0 (!%p291_p9), %vm1679_vm0, %v1678_v1  ;;  %v1846_v39 = vld [vmem:[%s1983_s3] sm:$0xff] (!%p291_p9)   ;;  %v1860_v42 = vld [vmem:[%s1984_s4 + $0x8] sm:$0xff] (!%p291_p9)   ;;  %vm718_vm5 = vcmask (!%p291_p9), 130048   ;;  %s323_s24 = sand.u32 (!%p291_p9), 1, %s1668_s10   ;;  %s1557_s27 = smul.u32 (!%p291_p9), 768, %s1754_s13 }
  0x10   : > { %1403 = vmatprep.subr.bf16.mxu0 (!%p291_p9), %v1678_v1  ;;  %1522 = vmatpush3.bf16.msra.mxu1 (!%p291_p9), %v1602_v0  ;;  %v1852_v40 = vld [vmem:[%s1984_s4] sm:$0xff] (!%p291_p9)   ;;  %v874_v43 = vsel (!%p291_p9), %vm860_vm4, %v1860_v42, 0  ;;  %s1680_s21 = smov (!%p291_p9), [#allocation2]  }
  0x11   : > { %1520 = vmatprep.subr.bf16.mxu1 (!%p291_p9), %v1678_v1  ;;  %1423 = vmatprep.mubr.msk.bf16.mxu1 (!%p291_p9), %vm1679_vm0, %v1678_v1  ;;  %v871_v41 = vsel (!%p291_p9), %vm860_vm4, %v1852_v40, 0  ;;  %s1618_s22 = sshll.u32 (!%p291_p9), %s1680_s21, 4  ;;  %s1619_s22 = int_to_ptr.vmem [resolvable:$false] %s1618_s22 }
  0x12   : > { %953 = vxpose.xlu0.c.b16.start.end [1/1] (short) (narrow) (!%p291_p9), %v1846_v39, 16  ;;  %s1620_s23 = scalar_lea.vmem (!%p291_p9), %s1619_s22, 1536 }
  0x13   : > { %1404 = vmatpush3.bf16.msra.mxu0 (!%p291_p9), %v1603_v2 }
  0x14   : > { %1405 = vmatprep.subr.bf16.mxu0 (!%p291_p9), %v1678_v1  ;;  %1523 = vmatpush3.bf16.msra.mxu1 (!%p291_p9), %v1603_v2 }
  0x15   : > { %s327_s25 = scalar_select %p326_p10, %s1754_s13, 1  ;;  %1521 = vmatprep.subr.bf16.mxu1 %v1678_v1 }
  0x16   : > { %s1939_s13 = scalar_lea.sflag [#allocation3], %s323_s24 }
  0x17   : > { %s1526_s28 = smul.u32 36, %s327_s25  ;;  %1406 = vmatpush3.bf16.msra.mxu0 %v1604_v3 }
  0x18   : > { %1524 = vmatpush3.bf16.msra.mxu1 %v1604_v3  ;;  %1469 = vmatprep.subr.bf16.mxu0 %v1678_v1  ;;  %s1525_s25 = smul.u32 48, %s323_s24 }
  0x19   : > { %s330_s16 = scalar_lea.vmem %s1980_s0, %s1526_s28  ;;  %1427 = vmatprep.subr.bf16.mxu1 %v1678_v1 }
  0x1a   : > { %v1605_v4 = vld [vmem:[%s330_s16] sm:$0xff]   ;;  %v1606_v6 = vld [vmem:[%s330_s16 + $0x8] sm:$0xff]   ;;  %v1607_v7 = vld [vmem:[%s330_s16 + $0x10] sm:$0xff]   ;;  %s325_s26 = scalar_lea.vmem [#allocation2], %s1525_s25 }
  0x1b   : > { %1408 = vmatmul.mubr.msk.bf16.vlgmr.msra.gmra.mrb[0].mxu0 %vm400_vm1, %v1605_v4  ;;  %v1609_v5 = vld [vmem:[%s330_s16 + $0x20] ss:$0 sps:$4 sm:$0xff]   ;;  %v1608_v8 = vld [vmem:[%s330_s16 + $0x18] sm:$0xff]   ;;  %s1246_s28 = sshll.u32 %s325_s26, 4  ;;  %s1929_s16 = scalar_lea.hbm %s1989_s9, %s1557_s27  ;;  %s1931_s28 = int_to_ptr.vmem [resolvable:$true] %s1246_s28 }
  0x1c   : > { %1411 = vmatprep.mubr.msk.bf16.mxu0 %vm1679_vm0, %v1678_v1  ;;  %1424 = vmatmul.mubr.msk.bf16.vlgmr.msra.gmra.mrb[0].mxu1 %vm400_vm1, %v1609_v5  ;;  %s1614_s17 = scalar_lea.vmem %s1931_s28, 768  ;;  %p1621_p0 = scmp.lt.s32.totalorder %s1931_s28, %s1619_s22 }
  0x1d   : > { %1431 = vmatprep.mubr.msk.bf16.mxu1 %vm1679_vm0, %v1678_v1  ;;  %p1615_p11 = scmp.ne.s32.totalorder %s1931_s28, %s1614_s17  ;;  %p1622_p1 = scmp.lt.s32.totalorder %s1620_s23, %s1614_s17 }
  0x1f   : > { %p1616_p12 = pnand %p1615_p11, %p1771_p5  ;;  %p1623_p2 = por %p1622_p1, %p1621_p0 }
  0x20   : > { %1470 = vmatpush3.bf16.xpose.msra.mxu0 %v871_v41 }
  0x21   : > { %1471 = vmatprep.subr.bf16.mxu0 %v1678_v1  ;;  %p1617_p13 = pneg %p1616_p12 }
  0x23   : > { %1412 = vmatmul.mubr.msk.bf16.gmra.mrb[4].mxu0 %vm400_vm1, %v1606_v6  ;;  %p1624_p3 = pnand %p1623_p2, %p1617_p13 }
  0x24   : > { %1415 = vmatprep.mubr.msk.bf16.mxu0 %vm1679_vm0, %v1678_v1 }
  0x28   : > { %1472 = vmatpush3.bf16.xpose.msra.mxu0 %v874_v43 }
  0x29   : > { %1503 = vmatprep.subr.bf16.mxu0 %v1678_v1 }
  0x2b   : > { %1416 = vmatmul.mubr.msk.bf16.gmra.mrb[8].mxu0 %vm400_vm1, %v1607_v7 }
  0x2c   : > { %1419 = vmatprep.mubr.msk.bf16.mxu0 %vm1679_vm0, %v1678_v1 }
  0x33   : > { %1420 = vmatmul.mubr.msk.bf16.gmra.mrb[12].mxu0 %vm400_vm1, %v1608_v8 }
  0x34   : > { %1473 = vmatprep.mubr.msk.bf16.mxu0 %vm1679_vm0, %v1678_v1 }
  0xee   : > { %v450_v9 = vpop.f32.mrb[0].mxu0 }
  0xef   : > { %v1409_v10 = vpop.f32.mrb[1].mxu0  ;;  %v482_v12 = vpop.f32.mrb[0].mxu1 }
  0xf0   : > { %v453_v11 = vpop.f32.mrb[2].mxu0  ;;  %v1425_v15 = vpop.f32.mrb[1].mxu1  ;;  %v603_v35 = vpack.c.bf16 %v482_v12, %v482_v12 }
  0xf1   : > { %v488_v13 = vpack.c.bf16 %v453_v11, %v450_v9  ;;  %v1410_v14 = vpop.f32.mrb[3].mxu0  ;;  %v485_v16 = vpop.f32.mrb[2].mxu1 }
  0xf2   : > { %v1426_v17 = vpop.f32.mrb[3].mxu1  ;;  %v605_v38 = vsel %vm499_vm2, %v603_v35, 0 }
  0xf3   : > { %1428 = vmatpush3.bf16.msra.mxu1 %v488_v13 }
  0xf4   : > { %1429 = vmatprep.subr.bf16.mxu1 %v1678_v1 }
  0xf6   : > { %v458_v18 = vpop.f32.mrb[4].mxu0 }
  0xf7   : > { %v489_v19 = vpack.c.bf16 %v458_v18, %v458_v18  ;;  %v1413_v20 = vpop.f32.mrb[5].mxu0 }
  0xf8   : > { %v461_v21 = vpop.f32.mrb[6].mxu0 }
  0xf9   : > { %v501_v22 = vsel %vm499_vm2, %v489_v19, 0  ;;  %v1414_v23 = vpop.f32.mrb[7].mxu0 }
  0xfa   : > { %1430 = vmatpush3.bf16.msra.mxu1 %v501_v22 }
  0xfb   : > { %1435 = vmatprep.subr.bf16.mxu1 %v1678_v1 }
  0xfd   : > { %1432 = vmatmul.mubr.msk.bf16.vlgmr.msra.gmra.mrb[4].mxu1 %vm495_vm3, %v1610_v24 }
  0xfe   : > { %v466_v25 = vpop.f32.mrb[8].mxu0  ;;  %1439 = vmatprep.mubr.msk.bf16.mxu1 %vm1679_vm0, %v1678_v1 }
  0xff   : > { %v550_v26 = vpack.c.bf16 %v466_v25, %v461_v21  ;;  %v1417_v27 = vpop.f32.mrb[9].mxu0 }
 0x100   : > { %v469_v28 = vpop.f32.mrb[10].mxu0 }
 0x101   : > { %v551_v29 = vpack.c.bf16 %v469_v28, %v469_v28  ;;  %v1418_v30 = vpop.f32.mrb[11].mxu0  ;;  %1436 = vmatpush3.bf16.msra.mxu1 %v550_v26 }
 0x102   : > { %1437 = vmatprep.subr.bf16.mxu1 %v1678_v1 }
 0x103   : > { %v553_v31 = vsel %vm499_vm2, %v551_v29, 0 }
 0x105   : > { %1438 = vmatpush3.bf16.msra.mxu1 %v553_v31 }
 0x106   : > { %v474_v32 = vpop.f32.mrb[12].mxu0  ;;  %1443 = vmatprep.subr.bf16.mxu1 %v1678_v1 }
 0x107   : > { %v1421_v33 = vpop.f32.mrb[13].mxu0 }
 0x108   : > { %v477_v34 = vpop.f32.mrb[14].mxu0  ;;  %1440 = vmatmul.mubr.msk.bf16.vlgmr.msra.gmra.mrb[8].mxu1 %vm495_vm3, %v1610_v24 }
 0x109   : > { %v602_v36 = vpack.c.bf16 %v477_v34, %v474_v32  ;;  %v1422_v37 = vpop.f32.mrb[15].mxu0  ;;  %1447 = vmatprep.mubr.msk.bf16.mxu1 %vm1679_vm0, %v1678_v1 }
 0x10b   : > { %1444 = vmatpush3.bf16.msra.mxu1 %v602_v36 }
 0x10c   : > { %1445 = vmatprep.subr.bf16.mxu1 %v1678_v1 }
 0x10f   : > { %1446 = vmatpush3.bf16.msra.mxu1 %v605_v38 }
 0x110   : > { %1451 = vmatprep.subr.bf16.mxu1 %v1678_v1 }
 0x112   : > { %1448 = vmatmul.mubr.msk.bf16.vlgmr.msra.gmra.mrb[12].mxu1 %vm495_vm3, %v1610_v24 }
 0x113   : > { %1453 = vmatprep.mubr.msk.bf16.mxu1 %vm1679_vm0, %v1678_v1 }
 0x1d0   : > { %v537_v44 = vpop.f32.mrb[4].mxu1 }
 0x1d1   : > { %v1433_v45 = vpop.f32.mrb[5].mxu1  ;;  %v1527_v48 = vround.rtne.f32 %v537_v44 }
 0x1d2   : > { %v540_v46 = vpop.f32.mrb[6].mxu1 }
 0x1d3   : > { %v1434_v47 = vpop.f32.mrb[7].mxu1  ;;  %v1528_v49 = vround.rtne.f32 %v540_v46  ;;  %v546_v50 = vmax.f32 %v1527_v48, 0.0 }
 0x1d5   : > { %v547_v51 = vmax.f32 %v1528_v49, 0.0  ;;  %v548_v55 = vmin.f32 %v546_v50, 255.0 }
 0x1d7   : > { %v549_v60 = vmin.f32 %v547_v51, 255.0  ;;  %v654_v63 = vmul.f32 0.299, %v548_v55  ;;  %v670_v0 = vmul.f32 -0.168736, %v548_v55  ;;  %v688_v2 = vmul.f32 0.5, %v548_v55 }
 0x1d9   : > { %v655_v6 = vmul.f32 0.299, %v549_v60  ;;  %v671_v7 = vmul.f32 -0.168736, %v549_v60  ;;  %v689_v9 = vmul.f32 0.5, %v549_v60 }
 0x1db   : > { %v589_v52 = vpop.f32.mrb[8].mxu1 }
 0x1dc   : > { %v1529_v53 = vround.rtne.f32 %v589_v52  ;;  %v1441_v54 = vpop.f32.mrb[9].mxu1 }
 0x1dd   : > { %v592_v56 = vpop.f32.mrb[10].mxu1 }
 0x1de   : > { %v598_v57 = vmax.f32 %v1529_v53, 0.0  ;;  %v1530_v58 = vround.rtne.f32 %v592_v56  ;;  %v1442_v59 = vpop.f32.mrb[11].mxu1 }
 0x1e0   : > { %v600_v61 = vmin.f32 %v598_v57, 255.0  ;;  %v599_v62 = vmax.f32 %v1530_v58, 0.0 }
 0x1e2   : > { %v656_v3 = vmul.f32 0.587, %v600_v61  ;;  %v672_v4 = vmul.f32 0.331264, %v600_v61  ;;  %v690_v5 = vmul.f32 0.418688, %v600_v61 }
 0x1e3   : > { %v601_v8 = vmin.f32 %v599_v62, 255.0 }
 0x1e4   : > { %v658_v10 = vadd.f32 %v656_v3, %v654_v63  ;;  %v674_v11 = vsub.f32 %v670_v0, %v672_v4  ;;  %v692_v12 = vsub.f32 %v688_v2, %v690_v5 }
 0x1e5   : > { %v657_v13 = vmul.f32 0.587, %v601_v8  ;;  %v673_v14 = vmul.f32 0.331264, %v601_v8  ;;  %v691_v15 = vmul.f32 0.418688, %v601_v8 }
 0x1e6   : > { %v641_v16 = vpop.f32.mrb[12].mxu1 }
 0x1e7   : > { %v659_v17 = vadd.f32 %v657_v13, %v655_v6  ;;  %v675_v18 = vsub.f32 %v671_v7, %v673_v14  ;;  %v693_v19 = vsub.f32 %v689_v9, %v691_v15  ;;  %v1531_v20 = vround.rtne.f32 %v641_v16  ;;  %v1449_v21 = vpop.f32.mrb[13].mxu1 }
 0x1e8   : > { %v644_v22 = vpop.f32.mrb[14].mxu1 }
 0x1e9   : > { %v650_v23 = vmax.f32 %v1531_v20, 0.0  ;;  %v1532_v24 = vround.rtne.f32 %v644_v22  ;;  %v1450_v25 = vpop.f32.mrb[15].mxu1 }
 0x1eb   : > { %v652_v26 = vmin.f32 %v650_v23, 255.0  ;;  %v651_v27 = vmax.f32 %v1532_v24, 0.0 }
 0x1ed   : > { %v660_v28 = vmul.f32 0.114, %v652_v26  ;;  %v676_v29 = vmul.f32 0.5, %v652_v26  ;;  %v694_v30 = vmul.f32 0.081312, %v652_v26  ;;  %v653_v31 = vmin.f32 %v651_v27, 255.0 }
 0x1ef   : > { %v662_v32 = vadd.f32 %v660_v28, %v658_v10  ;;  %v678_v33 = vadd.f32 %v676_v29, %v674_v11  ;;  %v696_v34 = vsub.f32 %v692_v12, %v694_v30  ;;  %v661_v35 = vmul.f32 0.114, %v653_v31 }
 0x1f0   : > { %v677_v36 = vmul.f32 0.5, %v653_v31  ;;  %v695_v37 = vmul.f32 0.081312, %v653_v31 }
 0x1f1   : > { %v1533_v38 = vround.rtne.f32 %v662_v32  ;;  %v680_v41 = vadd.f32 128.0, %v678_v33  ;;  %v698_v43 = vadd.f32 128.0, %v696_v34  ;;  %v663_v44 = vadd.f32 %v661_v35, %v659_v17  ;;  %v355_v32 = vld [vmem:[%s1985_s5] sm:$0xff] }
 0x1f2   : > { %v679_v45 = vadd.f32 %v677_v36, %v675_v18  ;;  %v697_v46 = vsub.f32 %v693_v19, %v695_v37  ;;  %v358_v34 = vld [vmem:[%s1988_s8] sm:$0xff] }
 0x1f3   : > { %v666_v47 = vmax.f32 %v1533_v38, 0.0  ;;  %v1535_v48 = vround.rtne.f32 %v680_v41  ;;  %v1537_v49 = vround.rtne.f32 %v698_v43  ;;  %v1534_v50 = vround.rtne.f32 %v663_v44 }
 0x1f4   : > { %v681_v51 = vadd.f32 128.0, %v679_v45  ;;  %v699_v52 = vadd.f32 128.0, %v697_v46 }
 0x1f5   : > { %v668_v53 = vmin.f32 %v666_v47, 255.0  ;;  %v684_v54 = vmax.f32 %v1535_v48, 0.0  ;;  %v702_v55 = vmax.f32 %v1537_v49, 0.0  ;;  %v667_v56 = vmax.f32 %v1534_v50, 0.0  ;;  %v961_v48 = vpop.trf.xlu0  ;;  %v357_v49 = vld [vmem:[%s1987_s7] sm:$0xff] }
 0x1f6   : > { %v1536_v57 = vround.rtne.f32 %v681_v51  ;;  %v1538_v58 = vround.rtne.f32 %v699_v52 }
 0x1f7   : > { %v669_v59 = vmin.f32 %v667_v56, 255.0  ;;  %v686_v62 = vmin.f32 %v684_v54, 255.0  ;;  %v704_v63 = vmin.f32 %v702_v55, 255.0  ;;  %v1330_v0 = vadd.f32 -128.0, %v668_v53 }
 0x1f8   : > { %v685_v60 = vmax.f32 %v1536_v57, 0.0  ;;  %v703_v61 = vmax.f32 %v1538_v58, 0.0 }
 0x1f9   : > { %v1331_v2 = vadd.f32 -128.0, %v669_v59  ;;  %v1332_v6 = vadd.f32 -128.0, %v686_v62  ;;  %v1334_v8 = vadd.f32 -128.0, %v704_v63 }
 0x1fa   : > { %v687_v3 = vmin.f32 %v685_v60, 255.0  ;;  %v705_v4 = vmin.f32 %v703_v61, 255.0 }
 0x1fb   : > { %v712_v5 = vpack.c.bf16 %v1331_v2, %v1330_v0 }
 0x1fc   : > { %v1333_v7 = vadd.f32 -128.0, %v687_v3  ;;  %v1335_v9 = vadd.f32 -128.0, %v705_v4 }
 0x1fd   : > { %1452 = vmatpush3.bf16.msra.mxu1 %v712_v5 }
 0x1fe   : > { %1457 = vmatprep.subr.bf16.mxu1 %v1678_v1  ;;  %v763_v10 = vpack.c.bf16 %v1333_v7, %v1332_v6  ;;  %v805_v11 = vpack.c.bf16 %v1335_v9, %v1334_v8 }
 0x200   : > { %1454 = vmatmul.mubr.msk.bf16.vlgmr.msra.gmra.mrb[16].mxu1 %vm718_vm5, %v1846_v39 }
 0x201   : > { %1458 = vmatpush3.bf16.msra.mxu1 %v763_v10  ;;  %1459 = vmatprep.mubr.msk.bf16.mxu1 %vm1679_vm0, %v1678_v1 }
 0x202   : > { %1463 = vmatprep.subr.bf16.mxu1 %v1678_v1 }
 0x208   : > { %1460 = vmatmul.mubr.msk.bf16.vlgmr.msra.gmra.mrb[20].mxu1 %vm718_vm5, %v1846_v39 }
 0x209   : > { %1464 = vmatpush3.bf16.msra.mxu1 %v805_v11  ;;  %1465 = vmatprep.mubr.msk.bf16.mxu1 %vm1679_vm0, %v1678_v1 }
 0x20a   : > { %1485 = vmatprep.subr.bf16.mxu1 %v1678_v1 }
 0x210   : > { %1466 = vmatmul.mubr.msk.bf16.vlgmr.msra.gmra.mrb[24].mxu1 %vm718_vm5, %v1846_v39 }
 0x211   : > { %1487 = vmatprep.mubr.msk.bf16.mxu1 %vm1679_vm0, %v1678_v1 }
 0x2d3   : > { %v756_v12 = vpop.f32.mrb[16].mxu1 }
 0x2d4   : > { %v1455_v13 = vpop.f32.mrb[17].mxu1 }
 0x2d5   : > { %v759_v14 = vpop.f32.mrb[18].mxu1 }
 0x2d6   : > { %v847_v15 = vpack.c.bf16 %v759_v14, %v756_v12  ;;  %v1456_v16 = vpop.f32.mrb[19].mxu1 }
 0x2d8   : > { %1474 = vmatmul.mubr.msk.bf16.vlgmr.msra.gmra.mrb[16].mxu0 %vm860_vm4, %v847_v15 }
 0x2d9   : > { %1477 = vmatprep.mubr.msk.bf16.mxu0 %vm1679_vm0, %v1678_v1  ;;  %1504 = vmatpush3.bf16.msra.mxu0 %v1852_v40  ;;  %v356_v40 = vld [vmem:[%s1986_s6] sm:$0xff] }
 0x2da   : > { %1505 = vmatprep.subr.bf16.mxu0 %v1678_v1 }
 0x2db   : > { %v798_v17 = vpop.f32.mrb[20].mxu1 }
 0x2dc   : > { %v1461_v18 = vpop.f32.mrb[21].mxu1 }
 0x2dd   : > { %v801_v39 = vpop.f32.mrb[22].mxu1  ;;  %1506 = vmatpush3.bf16.msra.mxu0 %v1860_v42 }
 0x2de   : > { %v848_v19 = vpack.c.bf16 %v801_v39, %v798_v17  ;;  %v1462_v20 = vpop.f32.mrb[23].mxu1 }
 0x2e0   : > { %1478 = vmatmul.mubr.msk.bf16.gmra.mrb[20].mxu0 %vm860_vm4, %v848_v19 }
 0x2e1   : > { %1481 = vmatprep.mubr.msk.bf16.mxu0 %vm1679_vm0, %v1678_v1 }
 0x2e3   : > { %v840_v21 = vpop.f32.mrb[24].mxu1 }
 0x2e4   : > { %v1467_v22 = vpop.f32.mrb[25].mxu1 }
 0x2e5   : > { %v843_v23 = vpop.f32.mrb[26].mxu1 }
 0x2e6   : > { %v849_v24 = vpack.c.bf16 %v843_v23, %v840_v21  ;;  %v1468_v25 = vpop.f32.mrb[27].mxu1 }
 0x2e8   : > { %1482 = vmatmul.mubr.msk.bf16.gmra.mrb[24].mxu0 %vm860_vm4, %v849_v24 }
 0x2e9   : > { %1507 = vmatprep.mubr.msk.bf16.mxu0 %vm1679_vm0, %v1678_v1 }
 0x3ab   : > { %v910_v42 = vpop.f32.mrb[16].mxu0 }
 0x3ac   : > { %v933_v26 = vmul.f32 %v910_v42, %v356_v40  ;;  %v1475_v27 = vpop.f32.mrb[17].mxu0 }
 0x3ad   : > { %v913_v28 = vpop.f32.mrb[18].mxu0 }
 0x3ae   : > { %v1539_v29 = vround.rtne.f32 %v933_v26  ;;  %v934_v30 = vmul.f32 %v913_v28, %v356_v40  ;;  %v1476_v31 = vpop.f32.mrb[19].mxu0 }
 0x3b0   : > { %v1540_v33 = vround.rtne.f32 %v934_v30  ;;  %v937_v35 = vmul.f32 %v1539_v29, %v355_v32 }
 0x3b2   : > { %v938_v36 = vmul.f32 %v1540_v33, %v355_v32 }
 0x3b3   : > { %v918_v37 = vpop.f32.mrb[20].mxu0 }
 0x3b4   : > { %v951_v38 = vpack.c.bf16 %v938_v36, %v937_v35  ;;  %v939_v41 = vmul.f32 %v918_v37, %v358_v34  ;;  %v1479_v43 = vpop.f32.mrb[21].mxu0 }
 0x3b5   : > { %v921_v44 = vpop.f32.mrb[22].mxu0 }
 0x3b6   : > { %v1541_v45 = vround.rtne.f32 %v939_v41  ;;  %v940_v46 = vmul.f32 %v921_v44, %v358_v34  ;;  %v1480_v47 = vpop.f32.mrb[23].mxu0  ;;  %1486 = vmatpush3.bf16.msra.mxu1 %v951_v38 }
 0x3b7   : > { %1491 = vmatprep.subr.bf16.mxu1 %v1678_v1 }
 0x3b8   : > { %v1542_v50 = vround.rtne.f32 %v940_v46  ;;  %v943_v51 = vmul.f32 %v1541_v45, %v357_v49 }
 0x3b9   : > { %1488 = vmatmul.mubr.msk.bf16.vlgmr.msra.gmra.mrb[28].mxu1 %vm718_vm5, %v961_v48 }
 0x3ba   : > { %v944_v52 = vmul.f32 %v1542_v50, %v357_v49  ;;  %1493 = vmatprep.mubr.msk.bf16.mxu1 %vm1679_vm0, %v1678_v1 }
 0x3bb   : > { %v926_v53 = vpop.f32.mrb[24].mxu0 }
 0x3bc   : > { %v1013_v54 = vpack.c.bf16 %v944_v52, %v943_v51  ;;  %v945_v55 = vmul.f32 %v926_v53, %v358_v34  ;;  %v1483_v56 = vpop.f32.mrb[25].mxu0 }
 0x3bd   : > { %v929_v57 = vpop.f32.mrb[26].mxu0 }
 0x3be   : > { %v1543_v58 = vround.rtne.f32 %v945_v55  ;;  %v946_v59 = vmul.f32 %v929_v57, %v358_v34  ;;  %v1484_v60 = vpop.f32.mrb[27].mxu0  ;;  %1492 = vmatpush3.bf16.msra.mxu1 %v1013_v54 }
 0x3bf   : > { %1497 = vmatprep.subr.bf16.mxu1 %v1678_v1 }
 0x3c0   : > { %v1544_v61 = vround.rtne.f32 %v946_v59  ;;  %v949_v62 = vmul.f32 %v1543_v58, %v357_v49 }
 0x3c1   : > { %1494 = vmatmul.mubr.msk.bf16.vlgmr.msra.gmra.mrb[32].mxu1 %vm718_vm5, %v961_v48 }
 0x3c2   : > { %v950_v63 = vmul.f32 %v1544_v61, %v357_v49  ;;  %1499 = vmatprep.mubr.msk.bf16.mxu1 %vm1679_vm0, %v1678_v1 }
 0x3c4   : > { %v1055_v0 = vpack.c.bf16 %v950_v63, %v949_v62 }
 0x3c6   : > { %1498 = vmatpush3.bf16.msra.mxu1 %v1055_v0 }
 0x3c9   : > { %1500 = vmatmul.mubr.msk.bf16.vlgmr.msra.gmra.mrb[36].mxu1 %vm718_vm5, %v961_v48 }
 0x48c   : > { %v1006_v2 = vpop.f32.mrb[28].mxu1 }
 0x48d   : > { %v1489_v3 = vpop.f32.mrb[29].mxu1 }
 0x48e   : > { %v1009_v4 = vpop.f32.mrb[30].mxu1 }
 0x48f   : > { %v1097_v5 = vpack.c.bf16 %v1009_v4, %v1006_v2  ;;  %v1490_v6 = vpop.f32.mrb[31].mxu1 }
 0x491   : > { %1508 = vmatmul.mubr.msk.bf16.vlgmr.msra.gmra.mrb[28].mxu0 %vm860_vm4, %v1097_v5 }
 0x492   : > { %1511 = vmatprep.mubr.msk.bf16.mxu0 %vm1679_vm0, %v1678_v1 }
 0x494   : > { %v1048_v7 = vpop.f32.mrb[32].mxu1 }
 0x495   : > { %v1495_v8 = vpop.f32.mrb[33].mxu1 }
 0x496   : > { %v1051_v9 = vpop.f32.mrb[34].mxu1 }
 0x497   : > { %v1098_v10 = vpack.c.bf16 %v1051_v9, %v1048_v7  ;;  %v1496_v11 = vpop.f32.mrb[35].mxu1 }
 0x499   : > { %1512 = vmatmul.mubr.msk.bf16.gmra.mrb[32].mxu0 %vm860_vm4, %v1098_v10 }
 0x49a   : > { %1515 = vmatprep.mubr.msk.bf16.mxu0 %vm1679_vm0, %v1678_v1 }
 0x49c   : > { %v1090_v12 = vpop.f32.mrb[36].mxu1 }
 0x49d   : > { %v1501_v13 = vpop.f32.mrb[37].mxu1 }
 0x49e   : > { %v1093_v14 = vpop.f32.mrb[38].mxu1 }
 0x49f   : > { %v1099_v15 = vpack.c.bf16 %v1093_v14, %v1090_v12  ;;  %v1502_v16 = vpop.f32.mrb[39].mxu1 }
 0x4a1   : > { %1516 = vmatmul.mubr.msk.bf16.gmra.mrb[36].mxu0 %vm860_vm4, %v1099_v15 }
 0x564   : > { %v1145_v17 = vpop.f32.mrb[28].mxu0 }
 0x565   : > { %v1509_v18 = vpop.f32.mrb[29].mxu0  ;;  %v1146_v20 = vadd.f32 128.0, %v1145_v17 }
 0x566   : > { %v1148_v39 = vpop.f32.mrb[30].mxu0 }
 0x567   : > { %v1510_v19 = vpop.f32.mrb[31].mxu0  ;;  %v1149_v21 = vadd.f32 128.0, %v1148_v39  ;;  %v1545_v25 = vround.rtne.f32 %v1146_v20 }
 0x569   : > { %v1546_v27 = vround.rtne.f32 %v1149_v21  ;;  %v1170_v30 = vmax.f32 %v1545_v25, 0.0 }
 0x56b   : > { %v1171_v33 = vmax.f32 %v1546_v27, 0.0  ;;  %v1172_v41 = vmin.f32 %v1170_v30, 255.0 }
 0x56c   : > { %v1153_v22 = vpop.f32.mrb[32].mxu0 }
 0x56d   : > { %v1154_v23 = vadd.f32 128.0, %v1153_v22  ;;  %v1513_v24 = vpop.f32.mrb[33].mxu0  ;;  %v1173_v49 = vmin.f32 %v1171_v33, 255.0 }
 0x56e   : > { %v1156_v40 = vpop.f32.mrb[34].mxu0 }
 0x56f   : > { %v1547_v42 = vround.rtne.f32 %v1154_v23  ;;  %v1157_v1 = vadd.f32 128.0, %v1156_v40  ;;  %v1514_v26 = vpop.f32.mrb[35].mxu0 }
 0x571   : > { %v1176_v28 = vmax.f32 %v1547_v42, 0.0  ;;  %v1548_v29 = vround.rtne.f32 %v1157_v1 }
 0x573   : > { %v1178_v31 = vmin.f32 %v1176_v28, 255.0  ;;  %v1177_v32 = vmax.f32 %v1548_v29, 0.0 }
 0x574   : > { %v1161_v34 = vpop.f32.mrb[36].mxu0 }
 0x575   : > { %v1353_v35 = vadd.f32 -128.0, %v1178_v31  ;;  %v1179_v36 = vmin.f32 %v1177_v32, 255.0  ;;  %v1162_v37 = vadd.f32 128.0, %v1161_v34  ;;  %v1517_v38 = vpop.f32.mrb[37].mxu0 }
 0x576   : > { %v1164_v43 = vpop.f32.mrb[38].mxu0 }
 0x577   : > { %v1200_v44 = vmul.f32 0.344136, %v1353_v35  ;;  %v1214_v45 = vmul.f32 1.772, %v1353_v35  ;;  %v1354_v46 = vadd.f32 -128.0, %v1179_v36  ;;  %v1549_v47 = vround.rtne.f32 %v1162_v37  ;;  %v1518_v48 = vpop.f32.mrb[39].mxu0 }
 0x578   : > { %v1165_v50 = vadd.f32 128.0, %v1164_v43 }
 0x579   : > { %v1202_v51 = vsub.f32 %v1172_v41, %v1200_v44  ;;  %v1216_v52 = vadd.f32 %v1214_v45, %v1172_v41  ;;  %v1201_v53 = vmul.f32 0.344136, %v1354_v46  ;;  %v1215_v54 = vmul.f32 1.772, %v1354_v46 }
 0x57a   : > { %v1182_v55 = vmax.f32 %v1549_v47, 0.0  ;;  %v1550_v56 = vround.rtne.f32 %v1165_v50 }
 0x57b   : > { %v1555_v57 = vround.rtne.f32 %v1216_v52  ;;  %v1203_v58 = vsub.f32 %v1173_v49, %v1201_v53  ;;  %v1217_v59 = vadd.f32 %v1215_v54, %v1173_v49 }
 0x57c   : > { %v1184_v60 = vmin.f32 %v1182_v55, 255.0  ;;  %v1183_v61 = vmax.f32 %v1550_v56, 0.0 }
 0x57d   : > { %v1220_v62 = vmax.f32 %v1555_v57, 0.0  ;;  %v1556_v63 = vround.rtne.f32 %v1217_v59 }
 0x57e   : > { %v1351_v0 = vadd.f32 -128.0, %v1184_v60  ;;  %v1185_v2 = vmin.f32 %v1183_v61, 255.0 }
 0x57f   : > { %v1222_v3 = vmin.f32 %v1220_v62, 255.0  ;;  %v1221_v4 = vmax.f32 %v1556_v63, 0.0 }
 0x580   : > { %v1188_v5 = vmul.f32 1.402, %v1351_v0  ;;  %v1204_v6 = vmul.f32 0.714136, %v1351_v0  ;;  %v1352_v7 = vadd.f32 -128.0, %v1185_v2 }
 0x581   : > { %1357 = vst.msk [vmem:[%s325_s26 + $0x20] sm:$0xff] %vm860_vm4, %v1222_v3  ;;  %v1223_v8 = vmin.f32 %v1221_v4, 255.0 }
 0x582   : > { %v1190_v9 = vadd.f32 %v1188_v5, %v1172_v41  ;;  %v1206_v10 = vsub.f32 %v1202_v51, %v1204_v6  ;;  %v1189_v11 = vmul.f32 1.402, %v1352_v7  ;;  %v1205_v12 = vmul.f32 0.714136, %v1352_v7 }
 0x583   : > { %1358 = vst.msk [vmem:[%s325_s26 + $0x28] sm:$0xff] %vm860_vm4, %v1223_v8 }
 0x584   : > { %v1551_v13 = vround.rtne.f32 %v1190_v9  ;;  %v1553_v14 = vround.rtne.f32 %v1206_v10  ;;  %v1191_v15 = vadd.f32 %v1189_v11, %v1173_v49  ;;  %v1207_v16 = vsub.f32 %v1203_v58, %v1205_v12 }
 0x586   : > { %v1194_v17 = vmax.f32 %v1551_v13, 0.0  ;;  %v1210_v18 = vmax.f32 %v1553_v14, 0.0  ;;  %v1552_v39 = vround.rtne.f32 %v1191_v15  ;;  %v1554_v19 = vround.rtne.f32 %v1207_v16 }
 0x588   : > { %v1196_v20 = vmin.f32 %v1194_v17, 255.0  ;;  %v1212_v21 = vmin.f32 %v1210_v18, 255.0  ;;  %v1195_v22 = vmax.f32 %v1552_v39, 0.0  ;;  %v1211_v23 = vmax.f32 %v1554_v19, 0.0 }
 0x58a   : > { %1224 = vst.msk [vmem:[%s325_s26] sm:$0xff] %vm860_vm4, %v1196_v20  ;;  %1355 = vst.msk [vmem:[%s325_s26 + $0x10] sm:$0xff] %vm860_vm4, %v1212_v21  ;;  %v1197_v24 = vmin.f32 %v1195_v22, 255.0  ;;  %v1213_v25 = vmin.f32 %v1211_v23, 255.0 }
 0x58c   : > { %1225 = vst.msk [vmem:[%s325_s26 + $0x8] sm:$0xff] %vm860_vm4, %v1197_v24  ;;  %1356 = vst.msk [vmem:[%s325_s26 + $0x18] sm:$0xff] %vm860_vm4, %v1213_v25 }
 0x58d   : > { %1627 = shalt.err (!%p1624_p3)
}
 0x58e   : > { %s1628_s24 = scalar_lea.hbm %s1929_s16, 768  ;;  %s1632_s27 = scalar_lea.hbm %s1989_s9, 1536 }
 0x58f   : > { %p1629_p4 = scmp.ne.s32.totalorder %s1929_s16, %s1628_s24  ;;  %p1633_p9 = scmp.lt.u32.totalorder %s1929_s16, %s1989_s9 }
 0x590   : > { %p1634_p10 = scmp.lt.u32.totalorder %s1632_s27, %s1628_s24  ;;  %p1636_p12 = scmp.lt.u32.totalorder %s1628_s24, %s1929_s16 }
 0x591   : > { %p1630_p7 = pnand %p1629_p4, %p1771_p5 }
 0x592   : > { %p1635_p11 = por %p1634_p10, %p1633_p9 }
 0x593   : > { %p1631_p8 = pneg %p1630_p7 }
 0x594   : > { %p1637_p13 = por %p1636_p12, %p1635_p11 }
 0x596   : > { %p1638_p0 = pnand %p1637_p13, %p1631_p8 }
 0x598   : > { %1641 = shalt.err (!%p1638_p0)
}
 0x599   : > { %s1681_s17 = smov 128   ;;  %s1682_s21 = smov 8  }
 0x59a   : > { %1558 = dma.vmem_to_hbm [thread:$0]  (%p1771_p5), %s1931_s28, 768, %s1929_s16, %s1939_s13, %s1681_s17, %s1681_s17, %s1682_s21  }
 0x59b PF: > { %p1564_p1 = scmp.ge.s32.totalorder %s1676_s12, 2  ;;  %s1261_s22 = sand.u32 1, %s1664_s30  }
 0x59c   : > { %s1262_s23 = scalar_lea.sflag [#allocation3], %s1261_s22 }
 0x59d   : > { %p1561_p2 = pnand %p1564_p1, %p1775_p6 }
 0x59f   : > { %1659 = dma.done.wait (!%p1561_p2), %s1262_s23, 768  }
 0x5a0   : > { %1661 = vsyncadd (!%p1561_p2), %s1262_s23, 4294966528  ;;  %p19_p3 = scmp.ge.s32.totalorder %s1758_s15, 4   ;;  %s1992_s30 = smov %s1668_s10 }
 0x5a1   : > { %s1993_s10 = smov %s1672_s11  ;;  %s1994_s11 = smov %s1769_s18 }
 0x5a2   : > { %s1995_s12 = smov %s1758_s15  ;;  %21 = sbr.rel (!%p19_p3) target bundleno = 3 (0x3), region = 93 }
 0x5a9   :  { %1267 = vsyncpa [#allocation3], 1 }
 0x5aa   :  { %1269 = vsyncpa [#allocation3 + $0x1], 1 }

</bundles_post_ra>
